<compile_context>
chip_gen: v7x
topology: tpu7x:2x2x1
jax: 0.10.0
libtpu: 0.0.40
codegen_flags: <defaults>
</compile_context>

<pallas_src>
import math
from functools import partial

import jax
import jax.numpy as jnp
from jax.experimental import pallas as pl
from jax.experimental.pallas import tpu as pltpu


def _round_up(x, m):
    return ((x + m - 1) // m) * m


# ----------------------------------------------------------------------------
# Pallas kernel: full MLP over one row tile, transposed (features x rows).
# ----------------------------------------------------------------------------
def _make_mlp_kernel(num_linear, sub_m, n_sub):
    """refs = (x_ref, w0, b0, w1, b1, ..., o_ref)

    x_ref : (in_dim_pad, tile_m)  compute dtype (bf16 or f32)
    w_l   : (d_out, d_in)         compute dtype (PyTorch Linear layout)
    b_l   : (d_out, 1)            f32
    o_ref : (out_dim, tile_m)     f32   (lane-dense: rows on the lane axis)
    """

    def kernel(x_ref, *rest):
        o_ref = rest[-1]
        params = rest[:-1]
        assert len(params) == 2 * num_linear

        # Static inner loop over lane sub-chunks: bounds vreg live ranges
        # (each chunk's activations die at its store) while keeping the big
        # row tile for DMA / overhead amortization.
        for c in range(n_sub):
            lo = c * sub_m
            h = x_ref[:, lo:lo + sub_m]                       # (in_dim, sub_m)
            for l in range(num_linear):
                w = params[2 * l][...]                        # (d_out, d_in)
                b = params[2 * l + 1][...]                    # (d_out, 1) f32
                h32 = jnp.dot(w, h, preferred_element_type=jnp.float32) + b
                if l < num_linear - 1:
                    h32 = jnp.tanh(h32)                       # f32 tanh (v5e-safe)
                    h = h32.astype(w.dtype)                   # matmul dtype for next layer
                else:
                    h = h32
            # Lane-dense store: full 128-lane vst's, no masking.
            o_ref[:, lo:lo + sub_m] = h.astype(o_ref.dtype)

    return kernel


# ----------------------------------------------------------------------------
# Parameter construction (PyTorch nn.Linear layout: W (d_out, d_in), b (d_out,)).
# ----------------------------------------------------------------------------
def init_mlp_params(key, input_dim=3, hidden_dim=64, n_layers=3, out_dim=1,
                    pos_enc=0):
    in_eff = input_dim * (1 + 2 * pos_enc) if pos_enc > 0 else input_dim
    dims = [in_eff] + [hidden_dim] * n_layers + [out_dim]
    params = []
    for d_in, d_out in zip(dims[:-1], dims[1:]):
        key, kw, kb = jax.random.split(key, 3)
        bound = 1.0 / math.sqrt(d_in)
        w = jax.random.uniform(kw, (d_out, d_in), jnp.float32, -bound, bound)
        b = jax.random.uniform(kb, (d_out,), jnp.float32, -bound, bound)
        params.append((w, b))
    return params


def positional_encoding(x, pos_enc):
    if pos_enc == 0:
        return x
    encs = [x]
    for i in range(1, pos_enc + 1):
        encs.append(jnp.sin((2.0 ** i) * jnp.pi * x))
        encs.append(jnp.cos((2.0 ** i) * jnp.pi * x))
    return jnp.concatenate(encs, axis=-1)


# ----------------------------------------------------------------------------
# Wrapper: concat, pos-enc, transpose to (features, rows), pad, pallas_call.
# ----------------------------------------------------------------------------
@partial(jax.jit, static_argnames=("pos_enc", "tile_m", "sub_m", "compute_dtype"))
def mlp_forward(t, x, y, params_flat, *, pos_enc=0, tile_m=512, sub_m=256,
                compute_dtype=jnp.bfloat16):
    def as_2d(a):
        return a[:, None] if a.ndim == 1 else a

    inputs = jnp.concatenate([as_2d(t), as_2d(x), as_2d(y)], axis=1)
    inputs = positional_encoding(inputs, pos_enc).astype(jnp.float32)

    n, in_dim = inputs.shape
    num_linear = len(params_flat) // 2
    out_dim = params_flat[-2].shape[0]        # last weight is (out_dim, hidden)

    # ---- tile sizing (static) ----------------------------------------------
    tile_m = max(128, _round_up(tile_m, 128))
    tile_m = min(tile_m, max(128, _round_up(n, 128)))   # don't over-pad tiny N
    sub_m = max(128, _round_up(min(sub_m, tile_m), 128))
    if tile_m % sub_m != 0:
        sub_m = tile_m
    n_sub = tile_m // sub_m

    n_pad = _round_up(max(n, 1), tile_m)
    in_dim_pad = _round_up(in_dim, 8)

    # ---- layout plumbing (wrapper side, pure data movement) ----------------
    # Rows -> lanes: feed the kernel a (features, rows) slab.
    x_t = jnp.zeros((in_dim_pad, n_pad), jnp.float32)
    x_t = x_t.at[:in_dim, :n].set(inputs.T)
    x_t = x_t.astype(compute_dtype)

    kernel_params = []
    for l in range(num_linear):
        w = params_flat[2 * l]                # (d_out, d_in), torch layout
        b = params_flat[2 * l + 1]            # (d_out,)
        if l == 0 and w.shape[1] != in_dim_pad:
            w = jnp.pad(w, ((0, 0), (0, in_dim_pad - w.shape[1])))
        kernel_params.append(w.astype(compute_dtype))
        kernel_params.append(b.reshape(-1, 1).astype(jnp.float32))

    kernel = _make_mlp_kernel(num_linear, sub_m, n_sub)

    in_specs = [pl.BlockSpec((in_dim_pad, tile_m), lambda i: (0, i))]
    for p in kernel_params:
        in_specs.append(pl.BlockSpec(p.shape, lambda i: (0, 0)))
    out_spec = pl.BlockSpec((out_dim, tile_m), lambda i: (0, i))

    out_t = pl.pallas_call(
        kernel,
        out_shape=jax.ShapeDtypeStruct((out_dim, n_pad), jnp.float32),
        grid_spec=pl.GridSpec(
            grid=(n_pad // tile_m,),
            in_specs=in_specs,
            out_specs=out_spec,
        ),
        compiler_params=pltpu.CompilerParams(
            dimension_semantics=("parallel",),
            vmem_limit_bytes=32 * 1024 * 1024,
        ),
    )(x_t, *kernel_params)

    # Back to (n, out_dim); padded rows sliced off.
    return out_t.T[:n]


# ----------------------------------------------------------------------------
# Pure-JAX reference (same dtype policy as the kernel for tight comparison).
# ----------------------------------------------------------------------------
def mlp_reference(t, x, y, params, pos_enc=0, compute_dtype=jnp.float32):
    def as_2d(a):
        return a[:, None] if a.ndim == 1 else a

    h = jnp.concatenate([as_2d(t), as_2d(x), as_2d(y)], axis=1).astype(jnp.float32)
    h = positional_encoding(h, pos_enc)
    for i, (w, b) in enumerate(params):
        h = jnp.dot(h.astype(compute_dtype), w.T.astype(compute_dtype),
                    preferred_element_type=jnp.float32) + b
        if i < len(params) - 1:
            h = jnp.tanh(h)
    return h


if __name__ == "__main__":
    key = jax.random.PRNGKey(0)

    # --- Test 1: module defaults at small shapes (N=8, hidden=32) -----------
    k_t, k_x, k_y, k_p, key = jax.random.split(key, 5)
    N = 8
    input_dim, hidden_dim, n_layers, out_dim, pos_enc = 3, 32, 3, 1, 0
    t = jax.random.normal(k_t, (N,), jnp.float32)
    x = jax.random.normal(k_x, (N,), jnp.float32)
    y = jax.random.normal(k_y, (N,), jnp.float32)
    params = init_mlp_params(k_p, input_dim, hidden_dim, n_layers, out_dim,
                             pos_enc)
    params_flat = tuple(p for wb in params for p in wb)

    out = mlp_forward(t, x, y, params_flat, pos_enc=pos_enc,
                      tile_m=512, sub_m=256, compute_dtype=jnp.bfloat16)
    out = jax.block_until_ready(out)
    ref = mlp_reference(t, x, y, params, pos_enc=pos_enc,
                        compute_dtype=jnp.bfloat16)
    assert out.shape == (N, out_dim), out.shape
    err = float(jnp.max(jnp.abs(out - ref)))
    assert jnp.allclose(out, ref, atol=5e-3, rtol=5e-3), ("test1 max err", err)

    # --- Test 2: multi-tile grid (grid=3) + positional encoding -------------
    k_t, k_x, k_y, k_p, key = jax.random.split(key, 5)
    N2, pos_enc2, hidden2 = 600, 1, 64
    t2 = jax.random.normal(k_t, (N2,), jnp.float32)
    x2 = jax.random.normal(k_x, (N2,), jnp.float32)
    y2 = jax.random.normal(k_y, (N2,), jnp.float32)
    params2 = init_mlp_params(k_p, 3, hidden2, 3, 1, pos_enc2)
    params2_flat = tuple(p for wb in params2 for p in wb)

    out2 = mlp_forward(t2, x2, y2, params2_flat, pos_enc=pos_enc2,
                       tile_m=256, sub_m=128, compute_dtype=jnp.bfloat16)
    out2 = jax.block_until_ready(out2)
    ref2 = mlp_reference(t2, x2, y2, params2, pos_enc=pos_enc2,
                         compute_dtype=jnp.bfloat16)
    assert out2.shape == (N2, 1), out2.shape
    err2 = float(jnp.max(jnp.abs(out2 - ref2)))
    assert jnp.allclose(out2, ref2, atol=5e-3, rtol=5e-3), ("test2 max err", err2)

    print("KERNEL_OK")
</pallas_src>

<mosaic_0001>
module attributes {stable_mosaic.version = 11 : i64} {
  func.func @kernel(%arg0: i32, %arg1: memref<8x128xbf16, #tpu.memory_space<vmem>>, %arg2: memref<32x8xbf16, #tpu.memory_space<vmem>>, %arg3: memref<32x1xf32, #tpu.memory_space<vmem>>, %arg4: memref<32x32xbf16, #tpu.memory_space<vmem>>, %arg5: memref<32x1xf32, #tpu.memory_space<vmem>>, %arg6: memref<32x32xbf16, #tpu.memory_space<vmem>>, %arg7: memref<32x1xf32, #tpu.memory_space<vmem>>, %arg8: memref<1x32xbf16, #tpu.memory_space<vmem>>, %arg9: memref<1x1xf32, #tpu.memory_space<vmem>>, %arg10: memref<1x128xf32, #tpu.memory_space<vmem>>) attributes {dimension_semantics = [#tpu.dimension_semantics<parallel>], iteration_bounds = array<i64: 1>, scalar_prefetch = 0 : i64, scratch_operands = 0 : i64, tpu.core_type = #tpu.core_type<tc>, window_params = [{transform_indices = @transform_0, window_bounds = array<i64: 8, 128>}, {pipeline_mode = #tpu.pipeline_mode<synchronous>, transform_indices = @transform_1, window_bounds = array<i64: 32, 8>}, {pipeline_mode = #tpu.pipeline_mode<synchronous>, transform_indices = @transform_2, window_bounds = array<i64: 32, 1>}, {pipeline_mode = #tpu.pipeline_mode<synchronous>, transform_indices = @transform_3, window_bounds = array<i64: 32, 32>}, {pipeline_mode = #tpu.pipeline_mode<synchronous>, transform_indices = @transform_4, window_bounds = array<i64: 32, 1>}, {pipeline_mode = #tpu.pipeline_mode<synchronous>, transform_indices = @transform_5, window_bounds = array<i64: 32, 32>}, {pipeline_mode = #tpu.pipeline_mode<synchronous>, transform_indices = @transform_6, window_bounds = array<i64: 32, 1>}, {pipeline_mode = #tpu.pipeline_mode<synchronous>, transform_indices = @transform_7, window_bounds = array<i64: 1, 32>}, {pipeline_mode = #tpu.pipeline_mode<synchronous>, transform_indices = @transform_8, window_bounds = array<i64: 1, 1>}, {transform_indices = @transform_9, window_bounds = array<i64: 1, 128>}]} {
    %c0 = arith.constant 0 : index
    %c0_0 = arith.constant 0 : index
    %0 = vector.load %arg1[%c0, %c0_0] : memref<8x128xbf16, #tpu.memory_space<vmem>>, vector<8x128xbf16>
    %c0_1 = arith.constant 0 : index
    %c0_2 = arith.constant 0 : index
    %1 = vector.load %arg2[%c0_1, %c0_2] : memref<32x8xbf16, #tpu.memory_space<vmem>>, vector<32x8xbf16>
    %c0_3 = arith.constant 0 : index
    %c0_4 = arith.constant 0 : index
    %2 = vector.load %arg3[%c0_3, %c0_4] : memref<32x1xf32, #tpu.memory_space<vmem>>, vector<32x1xf32>
    %cst = arith.constant dense<0.000000e+00> : vector<32x128xf32>
    %3 = tpu.matmul %1, %0, %cst {dimension_numbers = #tpu.dot_dimension_numbers<[1], [0], [0], [1], [0, 0, 1, 1], [], []>} : vector<32x8xbf16>, vector<8x128xbf16>, vector<32x128xf32> -> vector<32x128xf32>
    %4 = vector.broadcast %2 : vector<32x1xf32> to vector<32x128xf32>
    %5 = arith.addf %3, %4 : vector<32x128xf32>
    %6 = math.tanh %5 : vector<32x128xf32>
    %7 = arith.truncf %6 : vector<32x128xf32> to vector<32x128xbf16>
    %c0_5 = arith.constant 0 : index
    %c0_6 = arith.constant 0 : index
    %8 = vector.load %arg4[%c0_5, %c0_6] : memref<32x32xbf16, #tpu.memory_space<vmem>>, vector<32x32xbf16>
    %c0_7 = arith.constant 0 : index
    %c0_8 = arith.constant 0 : index
    %9 = vector.load %arg5[%c0_7, %c0_8] : memref<32x1xf32, #tpu.memory_space<vmem>>, vector<32x1xf32>
    %cst_9 = arith.constant dense<0.000000e+00> : vector<32x128xf32>
    %10 = tpu.matmul %8, %7, %cst_9 {dimension_numbers = #tpu.dot_dimension_numbers<[1], [0], [0], [1], [0, 0, 1, 1], [], []>} : vector<32x32xbf16>, vector<32x128xbf16>, vector<32x128xf32> -> vector<32x128xf32>
    %11 = vector.broadcast %9 : vector<32x1xf32> to vector<32x128xf32>
    %12 = arith.addf %10, %11 : vector<32x128xf32>
    %13 = math.tanh %12 : vector<32x128xf32>
    %14 = arith.truncf %13 : vector<32x128xf32> to vector<32x128xbf16>
    %c0_10 = arith.constant 0 : index
    %c0_11 = arith.constant 0 : index
    %15 = vector.load %arg6[%c0_10, %c0_11] : memref<32x32xbf16, #tpu.memory_space<vmem>>, vector<32x32xbf16>
    %c0_12 = arith.constant 0 : index
    %c0_13 = arith.constant 0 : index
    %16 = vector.load %arg7[%c0_12, %c0_13] : memref<32x1xf32, #tpu.memory_space<vmem>>, vector<32x1xf32>
    %cst_14 = arith.constant dense<0.000000e+00> : vector<32x128xf32>
    %17 = tpu.matmul %15, %14, %cst_14 {dimension_numbers = #tpu.dot_dimension_numbers<[1], [0], [0], [1], [0, 0, 1, 1], [], []>} : vector<32x32xbf16>, vector<32x128xbf16>, vector<32x128xf32> -> vector<32x128xf32>
    %18 = vector.broadcast %16 : vector<32x1xf32> to vector<32x128xf32>
    %19 = arith.addf %17, %18 : vector<32x128xf32>
    %20 = math.tanh %19 : vector<32x128xf32>
    %21 = arith.truncf %20 : vector<32x128xf32> to vector<32x128xbf16>
    %c0_15 = arith.constant 0 : index
    %c0_16 = arith.constant 0 : index
    %22 = vector.load %arg8[%c0_15, %c0_16] : memref<1x32xbf16, #tpu.memory_space<vmem>>, vector<1x32xbf16>
    %c0_17 = arith.constant 0 : index
    %c0_18 = arith.constant 0 : index
    %23 = vector.load %arg9[%c0_17, %c0_18] : memref<1x1xf32, #tpu.memory_space<vmem>>, vector<1x1xf32>
    %cst_19 = arith.constant dense<0.000000e+00> : vector<1x128xf32>
    %24 = tpu.matmul %22, %21, %cst_19 {dimension_numbers = #tpu.dot_dimension_numbers<[1], [0], [0], [1], [0, 0, 1, 1], [], []>} : vector<1x32xbf16>, vector<32x128xbf16>, vector<1x128xf32> -> vector<1x128xf32>
    %25 = vector.broadcast %23 : vector<1x1xf32> to vector<1x128xf32>
    %26 = arith.addf %24, %25 : vector<1x128xf32>
    %c0_20 = arith.constant 0 : index
    %c0_21 = arith.constant 0 : index
    %27 = vector.load %arg10[%c0_20, %c0_21] : memref<1x128xf32, #tpu.memory_space<vmem>>, vector<1x128xf32>
    tpu.vector_store %arg10[%c0_20, %c0_21], %26 {strides = array<i32>} : memref<1x128xf32, #tpu.memory_space<vmem>>, vector<1x128xf32>,
    return
  }
  func.func @transform_0(%arg0: i32) -> (i32, i32) {
    %c0_i32 = arith.constant 0 : i32
    %c0_i32_0 = arith.constant 0 : i32
    return %c0_i32, %arg0 : i32, i32
  }
  func.func @transform_1(%arg0: i32) -> (i32, i32) {
    %c0_i32 = arith.constant 0 : i32
    %c0_i32_0 = arith.constant 0 : i32
    %c0_i32_1 = arith.constant 0 : i32
    return %c0_i32, %c0_i32_0 : i32, i32
  }
  func.func @transform_2(%arg0: i32) -> (i32, i32) {
    %c0_i32 = arith.constant 0 : i32
    %c0_i32_0 = arith.constant 0 : i32
    %c0_i32_1 = arith.constant 0 : i32
    return %c0_i32, %c0_i32_0 : i32, i32
  }
  func.func @transform_3(%arg0: i32) -> (i32, i32) {
    %c0_i32 = arith.constant 0 : i32
    %c0_i32_0 = arith.constant 0 : i32
    %c0_i32_1 = arith.constant 0 : i32
    return %c0_i32, %c0_i32_0 : i32, i32
  }
  func.func @transform_4(%arg0: i32) -> (i32, i32) {
    %c0_i32 = arith.constant 0 : i32
    %c0_i32_0 = arith.constant 0 : i32
    %c0_i32_1 = arith.constant 0 : i32
    return %c0_i32, %c0_i32_0 : i32, i32
  }
  func.func @transform_5(%arg0: i32) -> (i32, i32) {
    %c0_i32 = arith.constant 0 : i32
    %c0_i32_0 = arith.constant 0 : i32
    %c0_i32_1 = arith.constant 0 : i32
    return %c0_i32, %c0_i32_0 : i32, i32
  }
  func.func @transform_6(%arg0: i32) -> (i32, i32) {
    %c0_i32 = arith.constant 0 : i32
    %c0_i32_0 = arith.constant 0 : i32
    %c0_i32_1 = arith.constant 0 : i32
    return %c0_i32, %c0_i32_0 : i32, i32
  }
  func.func @transform_7(%arg0: i32) -> (i32, i32) {
    %c0_i32 = arith.constant 0 : i32
    %c0_i32_0 = arith.constant 0 : i32
    %c0_i32_1 = arith.constant 0 : i32
    return %c0_i32, %c0_i32_0 : i32, i32
  }
  func.func @transform_8(%arg0: i32) -> (i32, i32) {
    %c0_i32 = arith.constant 0 : i32
    %c0_i32_0 = arith.constant 0 : i32
    %c0_i32_1 = arith.constant 0 : i32
    return %c0_i32, %c0_i32_0 : i32, i32
  }
  func.func @transform_9(%arg0: i32) -> (i32, i32) {
    %c0_i32 = arith.constant 0 : i32
    %c0_i32_0 = arith.constant 0 : i32
    return %c0_i32, %arg0 : i32, i32
  }
}

</mosaic_0001>

<bundles_post_ra>
// kernel: mlp_forward.1
= control target key start
LH: loop header
LB: loop body
LE: loop exit
PB: predicated region body
PF: predicated region fallthrough
CT: control target
= control target key end

     0   :  { %vm81_vm0 = vcmask 1043456   ;;  %vm74_vm1 = vcmask 64512   ;;  %v491_v1 = vmov 0   ;;  %vm178_vm2 = vcmask 261120   ;;  %s617_s0 = inlined_call_operand.vmem [shape: bf16[8,128], index: 0, kind: input, shape index: {}]   ;;  %s618_s1 = inlined_call_operand.vmem [shape: bf16[32,8], index: 1, kind: input, shape index: {}]   ;;  %s619_s2 = inlined_call_operand.vmem [shape: f32[32,1], index: 2, kind: input, shape index: {}]   ;;  %s620_s8 = inlined_call_operand.<no memory space> [shape: f32[1,1], index: 8, kind: input, shape index: {}]   ;;  %s621_s4 = inlined_call_operand.vmem [shape: f32[32,1], index: 4, kind: input, shape index: {}]   ;;  %s622_s6 = inlined_call_operand.vmem [shape: f32[32,1], index: 6, kind: input, shape index: {}]   ;;  %s623_s3 = inlined_call_operand.vmem [shape: bf16[32,32], index: 3, kind: input, shape index: {}]   ;;  %s624_s5 = inlined_call_operand.vmem [shape: bf16[32,32], index: 5, kind: input, shape index: {}]   ;;  %s625_s7 = inlined_call_operand.vmem [shape: bf16[1,32], index: 7, kind: input, shape index: {}]   ;;  %s626_s9 = inlined_call_operand.vmem [shape: f32[1,128], index: 9, kind: output, shape index: {}]  }
   0x1   :  { %v35_v0 = vld [vmem:[%s617_s0] sm:$0xf]  ;;  %459 = vset.pattern.permute.xlu0 %v491_v1  ;;  %460 = vset.pattern.permute.xlu1 %v491_v1  ;;  %v14_v2 = vstv %s620_s8  ;;  %v462_v5 = vld [vmem:[%s618_s1 + $0x8] sm:$0xff]   ;;  %v42_v7 = vld [vmem:[%s619_s2 + $0x10] sm:$0xff]  ;;  %v492_v59 = vmov 0.0   ;;  %vm493_vm3 = vmmov 0  }
   0x2   :  { %455 = vmatprep.subr.msk.bf16.mxu0 %vm81_vm0, %v35_v0  ;;  %v83_v3 = vsel %vm81_vm0, %v35_v0, 0  ;;  %v461_v4 = vld [vmem:[%s618_s1] sm:$0xff]   ;;  %15 = vst [vmem:[#allocation2] sm:$0x1] %v14_v2  ;;  %v41_v8 = vld [vmem:[%s619_s2 + $0x8] sm:$0xff]  ;;  %56 = vperm.xlu1 %460, %v42_v7   ;;  %v43_v9 = vld [vmem:[%s619_s2 + $0x18] sm:$0xff] }
   0x3   :  { %426 = vmatpush3.bf16.msra.mxu0 %v83_v3  ;;  %v40_v6 = vld [vmem:[%s619_s2] sm:$0xff]  ;;  %427 = vmatprep.mubr.msk.bf16.mxu0 %vm74_vm1, %v461_v4  ;;  %v145_v11 = vld [vmem:[%s621_s4 + $0x8] sm:$0xff]  ;;  %v146_v12 = vld [vmem:[%s621_s4 + $0x10] sm:$0xff] }
   0x4   :  { %46 = vperm.xlu0 %459, %v40_v6   ;;  %v144_v10 = vld [vmem:[%s621_s4] sm:$0xff]  ;;  %v147_v13 = vld [vmem:[%s621_s4 + $0x18] sm:$0xff]  ;;  %v245_v15 = vld [vmem:[%s622_s6 + $0x8] sm:$0xff] }
   0x5   :  { %v244_v14 = vld [vmem:[%s622_s6] sm:$0xff]  ;;  %v246_v16 = vld [vmem:[%s622_s6 + $0x10] sm:$0xff]  ;;  %v247_v17 = vld [vmem:[%s622_s6 + $0x18] sm:$0xff] }
   0x6   :  { %428 = vmatmul.mubr.msk.bf16.vlgmr.msra.gmra.mrb[0].mxu0 %vm74_vm1, %v462_v5  ;;  %61 = vperm.xlu1 %460, %v43_v9   ;;  %v463_v19 = vld [vmem:[%s623_s3] sm:$0xff]   ;;  %v464_v38 = vld [vmem:[%s623_s3 + $0x8] sm:$0xff]  }
   0x7   :  { %435 = vmatprep.mubr.msk.bf16.mxu1 %vm178_vm2, %v463_v19  ;;  %v465_v39 = vld [vmem:[%s624_s5] sm:$0xff]   ;;  %v466_v58 = vld [vmem:[%s624_s5 + $0x8] sm:$0xff]  }
   0x8   :  { %51 = vperm.xlu0 %459, %v41_v8   ;;  %443 = vmatprep.mubr.msk.bf16.mxu0 %vm178_vm2, %v465_v39 }
   0x9   :  { %v340_v18 = vld [vmem:[#allocation2] sm:$0x1] }
   0xa   :  { %155 = vperm.xlu1 %460, %v145_v11  }
   0xc   :  { %150 = vperm.xlu0 %459, %v144_v10  }
   0xe   :  { %165 = vperm.xlu1 %460, %v147_v13  }
  0x10   :  { %160 = vperm.xlu0 %459, %v146_v12  }
  0x12   :  { %255 = vperm.xlu1 %460, %v245_v15   ;;  %v346_v15 = vlaneseq }
  0x14   :  { %250 = vperm.xlu0 %459, %v244_v14   ;;  %v339_v14 = vld [vmem:[%s625_s7] sm:$0x1] }
  0x16   :  { %265 = vperm.xlu1 %460, %v247_v17  }
  0x18   :  { %260 = vperm.xlu0 %459, %v246_v16   ;;  %v347_v16 = vshrl.u32 %v346_v15, 7 }
  0x1a   :  { %v348_v17 = vsub.s32 0, %v347_v16 }
  0x1c   :  { %343 = vperm.xlu0 %459, %v340_v18  }
  0x81   :  { %v57_v20 = vpop.permute.xlu1 %56 }
  0x83   :  { %v47_v21 = vpop.permute.xlu0 %46 }
  0x85   :  { %v62_v25 = vpop.permute.xlu1 %61 }
  0x87   :  { %v52_v28 = vpop.permute.xlu0 %51 }
  0x89   :  { %v156_v41 = vpop.permute.xlu1 %155 }
  0x8b   :  { %v151_v40 = vpop.permute.xlu0 %150 }
  0x8d   :  { %v166_v46 = vpop.permute.xlu1 %165 }
  0x8f   :  { %v161_v42 = vpop.permute.xlu0 %160 }
  0x91   :  { %v256_v61 = vpop.permute.xlu1 %255 }
  0x93   :  { %v251_v60 = vpop.permute.xlu0 %250 }
  0x95   :  { %v266_v2 = vpop.permute.xlu1 %265 }
  0x97   :  { %v261_v62 = vpop.permute.xlu0 %260 }
  0x9b   :  { %v344_v18 = vpop.permute.xlu0 %343 }
  0x9c   :  { %v349_v19 = vrot.slane %v344_v18, %v348_v17 }
  0xd9   :  { %v429_v22 = vpop.f32.mrb[0].mxu0 }
  0xda   :  { %v128_v23 = vadd.f32 %v429_v22, %v57_v20  ;;  %v119_v24 = vpop.f32.mrb[1].mxu0 }
  0xdb   :  { %v120_v26 = vadd.f32 %v119_v24, %v47_v21  ;;  %v430_v27 = vpop.f32.mrb[2].mxu0 }
  0xdc   :  { %467 = vtanh.f32 %v128_v23  ;;  %v131_v29 = vadd.f32 %v430_v27, %v62_v25  ;;  %v122_v30 = vpop.f32.mrb[3].mxu0 }
  0xdd   :  { %469 = vtanh.f32 %v120_v26  ;;  %v123_v31 = vadd.f32 %v122_v30, %v52_v28 }
  0xde   :  { %471 = vtanh.f32 %v131_v29 }
  0xdf   :  { %473 = vtanh.f32 %v123_v31 }
  0xe6   :  { %v468_v32 = vpop.eup %467 }
  0xe7   :  { %v470_v33 = vpop.eup %469 }
  0xe8   :  { %v472_v34 = vpop.eup %471 }
  0xe9   :  { %v474_v35 = vpop.eup %473  ;;  %v139_v36 = vpack.c.bf16 %v472_v34, %v468_v32 }
  0xea   :  { %v138_v37 = vpack.c.bf16 %v474_v35, %v470_v33 }
  0xec   :  { %431 = vmatprep.subr.bf16.mxu1 %v138_v37 }
  0xed   :  { %432 = vmatpush3.bf16.msra.mxu1 %v138_v37 }
  0xee   :  { %433 = vmatprep.subr.bf16.mxu1 %v139_v36 }
  0xf1   :  { %434 = vmatpush3.bf16.msra.mxu1 %v139_v36 }
  0xf2   :  { %447 = vmatprep.subr.bf16.mxu1 %v492_v59 }
  0xf4   :  { %436 = vmatmul.mubr.msk.bf16.vlgmr.msra.gmra.mrb[0].mxu1 %vm178_vm2, %v464_v38 }
  0xf5   :  { %451 = vmatprep.mubr.msk.bf16.mxu1 %vm493_vm3, %v492_v59 }
 0x1c7   :  { %v437_v43 = vpop.f32.mrb[0].mxu1 }
 0x1c8   :  { %v228_v44 = vadd.f32 %v437_v43, %v161_v42  ;;  %v219_v45 = vpop.f32.mrb[1].mxu1 }
 0x1c9   :  { %v220_v47 = vadd.f32 %v219_v45, %v151_v40  ;;  %v438_v48 = vpop.f32.mrb[2].mxu1 }
 0x1ca   :  { %475 = vtanh.f32 %v228_v44  ;;  %v231_v49 = vadd.f32 %v438_v48, %v166_v46  ;;  %v222_v50 = vpop.f32.mrb[3].mxu1 }
 0x1cb   :  { %477 = vtanh.f32 %v220_v47  ;;  %v223_v51 = vadd.f32 %v222_v50, %v156_v41 }
 0x1cc   :  { %479 = vtanh.f32 %v231_v49 }
 0x1cd   :  { %481 = vtanh.f32 %v223_v51 }
 0x1d4   :  { %v476_v52 = vpop.eup %475 }
 0x1d5   :  { %v478_v53 = vpop.eup %477 }
 0x1d6   :  { %v480_v54 = vpop.eup %479 }
 0x1d7   :  { %v482_v55 = vpop.eup %481  ;;  %v239_v56 = vpack.c.bf16 %v480_v54, %v476_v52 }
 0x1d8   :  { %v238_v57 = vpack.c.bf16 %v482_v55, %v478_v53 }
 0x1da   :  { %439 = vmatprep.subr.bf16.mxu0 %v238_v57 }
 0x1db   :  { %440 = vmatpush3.bf16.msra.mxu0 %v238_v57 }
 0x1dc   :  { %441 = vmatprep.subr.bf16.mxu0 %v239_v56 }
 0x1df   :  { %442 = vmatpush3.bf16.msra.mxu0 %v239_v56 }
 0x1e2   :  { %444 = vmatmul.mubr.msk.bf16.vlgmr.msra.gmra.mrb[4].mxu0 %vm178_vm2, %v466_v58 }
 0x2b5   :  { %v445_v63 = vpop.f32.mrb[4].mxu0 }
 0x2b6   :  { %v327_v0 = vadd.f32 %v445_v63, %v261_v62  ;;  %v318_v1 = vpop.f32.mrb[5].mxu0 }
 0x2b7   :  { %v319_v3 = vadd.f32 %v318_v1, %v251_v60  ;;  %v446_v4 = vpop.f32.mrb[6].mxu0 }
 0x2b8   :  { %483 = vtanh.f32 %v327_v0  ;;  %v330_v5 = vadd.f32 %v446_v4, %v266_v2  ;;  %v321_v6 = vpop.f32.mrb[7].mxu0 }
 0x2b9   :  { %485 = vtanh.f32 %v319_v3  ;;  %v322_v7 = vadd.f32 %v321_v6, %v256_v61 }
 0x2ba   :  { %487 = vtanh.f32 %v330_v5 }
 0x2bb   :  { %489 = vtanh.f32 %v322_v7 }
 0x2c2   :  { %v484_v8 = vpop.eup %483 }
 0x2c3   :  { %v486_v9 = vpop.eup %485 }
 0x2c4   :  { %v488_v10 = vpop.eup %487 }
 0x2c5   :  { %v490_v11 = vpop.eup %489  ;;  %v338_v12 = vpack.c.bf16 %v488_v10, %v484_v8 }
 0x2c6   :  { %v337_v13 = vpack.c.bf16 %v490_v11, %v486_v9 }
 0x2c8   :  { %448 = vmatpush3.bf16.msra.mxu1 %v337_v13 }
 0x2c9   :  { %449 = vmatprep.subr.bf16.mxu1 %v492_v59 }
 0x2cc   :  { %450 = vmatpush3.bf16.msra.mxu1 %v338_v12 }
 0x2cf   :  { %452 = vmatmul.mubr.msk.bf16.vlgmr.msra.gmra.mrb[4].mxu1 %vm178_vm2, %v339_v14 }
 0x3a2   :  { %v387_v20 = vpop.f32.mrb[4].mxu1 }
 0x3a3   :  { %v388_v21 = vadd.f32 %v387_v20, %v349_v19  ;;  %v453_v22 = vpop.f32.mrb[5].mxu1 }
 0x3a4   :  { %v390_v23 = vpop.f32.mrb[6].mxu1 }
 0x3a5   :  { %393 = vst [vmem:[%s626_s9] sm:$0x1] %v388_v21  ;;  %v454_v24 = vpop.f32.mrb[7].mxu1 }

</bundles_post_ra>
